<compile_context>
chip_gen: v6e
topology: v6e:2x2x1
jax: 0.10.0
libtpu: 0.0.40
codegen_flags: <defaults>
</compile_context>

<pallas_src>
import functools

import jax
import jax.numpy as jnp
from jax.experimental import pallas as pl
from jax.experimental.pallas import tpu as pltpu


# ---------------------------------------------------------------------------
# Kernels
# ---------------------------------------------------------------------------
def _zero_mul_kernel(x_ref, o_ref):
    # Exact PyTorch semantics of x.mul(0.0): NaN/Inf -> NaN, -x -> -0.0.
    # The VPU multiply is free under the HBM roofline; the cost is the DMAs.
    o_ref[...] = x_ref[...] * 0.0


def _zero_fill_kernel(o_ref):
    # Write-only fast path: no input read -> half the HBM traffic.
    o_ref[...] = jnp.zeros(o_ref.shape, o_ref.dtype)


# ---------------------------------------------------------------------------
# Tiling constants
# ---------------------------------------------------------------------------
_LANE_CANDIDATES = (4096, 2048, 1024, 512, 256, 128)
_TARGET_TILE_BYTES = 6 * 1024 * 1024   # ~6 MiB/block: step overhead <10% at v7x BW
_VMEM_LIMIT_BYTES = 48 * 1024 * 1024   # in+out double-buffered 6 MiB blocks = 24 MiB
_SPLIT_BYTES = 2 * 1024 * 1024         # split mid-sized slabs so v7x's 2 TCs both work
_MIN_SPLIT_STEPS = 4


def _round_up(a: int, m: int) -> int:
    return ((a + m - 1) // m) * m


@functools.partial(jax.jit, static_argnames=("exact_special_values",))
def zero_forward(x: jax.Array, exact_special_values: bool = True) -> jax.Array:
    """Pallas equivalent of Zero().forward(x) == x.mul(0.0).

    exact_special_values=True  -> read+multiply path (bit-exact NaN/Inf/-0.0).
    exact_special_values=False -> write-only zero-fill path (~2x less HBM traffic).
    """
    orig_shape = x.shape
    total = x.size

    is_inexact = jnp.issubdtype(x.dtype, jnp.inexact)
    # PyTorch: int/bool tensor .mul(0.0) type-promotes to the default float.
    out_dtype = x.dtype if is_inexact else jnp.float32
    use_mul = bool(exact_special_values) and is_inexact

    if total == 0:
        return jnp.zeros(orig_shape, out_dtype)

    in_itemsize = jnp.dtype(x.dtype).itemsize
    out_itemsize = jnp.dtype(out_dtype).itemsize
    itemsize = max(in_itemsize, out_itemsize) if use_mul else out_itemsize

    # ---- geometry: lane-dense slab, no wrapper-side pad or slice -----------
    lane = next((w for w in _LANE_CANDIDATES if total % w == 0), None)
    if lane is not None:
        rows = total // lane
        slab_shape = (rows, lane)
        tr_budget = max(32, (_TARGET_TILE_BYTES // (lane * itemsize)) // 32 * 32)
        if rows <= tr_budget:
            if total * itemsize > _SPLIT_BYTES and rows >= 2 * 32:
                # Mid-sized slab: >=4 blocks so both v7x TensorCores get work.
                tr = max(32, _round_up(pl.cdiv(rows, _MIN_SPLIT_STEPS), 32))
            else:
                tr = rows  # full-extent rows dim: exempt from (8,128) rule
        else:
            tr = tr_budget
        block = (tr, lane)
        grid = (pl.cdiv(rows, tr),)
        index_map = lambda i: (i, 0)
    else:
        # Rare fallback: flat length not a multiple of 128.  Single-row slab,
        # 128-wide-multiple blocks; Pallas masks the ragged final block.
        # Chunk budget accounts for the 8x sublane padding of a 1-row block.
        slab_shape = (1, total)
        chunk = max(128, (_TARGET_TILE_BYTES // (8 * itemsize)) // 128 * 128)
        if total <= chunk:
            chunk = _round_up(total, 128)
        block = (1, chunk)
        grid = (pl.cdiv(total, chunk),)
        index_map = lambda i: (0, i)

    out_spec = pl.BlockSpec(block, index_map)
    compiler_params = pltpu.CompilerParams(
        dimension_semantics=("parallel",),   # shard grid steps across v7x's 2 TCs
        vmem_limit_bytes=_VMEM_LIMIT_BYTES,
    )

    if use_mul:
        cost = pl.CostEstimate(
            flops=total, transcendentals=0,
            bytes_accessed=total * (in_itemsize + out_itemsize))
        out2d = pl.pallas_call(
            _zero_mul_kernel,
            out_shape=jax.ShapeDtypeStruct(slab_shape, out_dtype),
            grid=grid,
            in_specs=[pl.BlockSpec(block, index_map)],
            out_specs=out_spec,
            compiler_params=compiler_params,
            cost_estimate=cost,
        )(x.reshape(slab_shape))
    else:
        cost = pl.CostEstimate(
            flops=0, transcendentals=0, bytes_accessed=total * out_itemsize)
        out2d = pl.pallas_call(
            _zero_fill_kernel,
            out_shape=jax.ShapeDtypeStruct(slab_shape, out_dtype),
            grid=grid,
            out_specs=out_spec,
            compiler_params=compiler_params,
            cost_estimate=cost,
        )()

    return out2d.reshape(orig_shape)


if __name__ == "__main__":
    key = jax.random.PRNGKey(0)
    x = jax.random.normal(key, (2, 4, 16, 16), dtype=jnp.float32)

    # Exact path (default): matches x.mul(0.0) including NaN/Inf/-0.0 handling.
    out = jax.block_until_ready(zero_forward(x))
    expected = x * 0.0
    assert out.shape == x.shape
    assert out.dtype == x.dtype
    assert bool(jnp.allclose(out, expected)), "exact path mismatch vs reference"

    # Flag-gated write-only fast path (~2x less HBM traffic).
    out_fast = jax.block_until_ready(zero_forward(x, exact_special_values=False))
    assert out_fast.shape == x.shape
    assert out_fast.dtype == x.dtype
    assert bool(jnp.allclose(out_fast, jnp.zeros_like(x))), "fill path mismatch"

    print("KERNEL_OK")
</pallas_src>

<mosaic_0001>
module attributes {stable_mosaic.version = 11 : i64} {
  func.func @_zero_mul_kernel(%arg0: i32, %arg1: memref<1x2048xf32, #tpu.memory_space<vmem>>, %arg2: memref<1x2048xf32, #tpu.memory_space<vmem>>) attributes {dimension_semantics = [#tpu.dimension_semantics<parallel>], iteration_bounds = array<i64: 1>, scalar_prefetch = 0 : i64, scratch_operands = 0 : i64, tpu.core_type = #tpu.core_type<tc>, window_params = [{transform_indices = @transform_0, window_bounds = array<i64: 1, 2048>}, {transform_indices = @transform_1, window_bounds = array<i64: 1, 2048>}]} {
    %c0 = arith.constant 0 : index
    %c0_0 = arith.constant 0 : index
    %0 = vector.load %arg1[%c0, %c0_0] : memref<1x2048xf32, #tpu.memory_space<vmem>>, vector<1x2048xf32>
    %cst = arith.constant 0.000000e+00 : f32
    %1 = vector.broadcast %cst : f32 to vector<1x2048xf32>
    %2 = arith.mulf %0, %1 : vector<1x2048xf32>
    %c0_1 = arith.constant 0 : index
    %c0_2 = arith.constant 0 : index
    %3 = vector.load %arg2[%c0_1, %c0_2] : memref<1x2048xf32, #tpu.memory_space<vmem>>, vector<1x2048xf32>
    tpu.vector_store %arg2[%c0_1, %c0_2], %2 {strides = array<i32>} : memref<1x2048xf32, #tpu.memory_space<vmem>>, vector<1x2048xf32>,
    return
  }
  func.func @transform_0(%arg0: i32) -> (i32, i32) {
    %c0_i32 = arith.constant 0 : i32
    %c0_i32_0 = arith.constant 0 : i32
    return %arg0, %c0_i32 : i32, i32
  }
  func.func @transform_1(%arg0: i32) -> (i32, i32) {
    %c0_i32 = arith.constant 0 : i32
    %c0_i32_0 = arith.constant 0 : i32
    return %arg0, %c0_i32 : i32, i32
  }
}

</mosaic_0001>

<bundles_post_ra>
// kernel: zero_forward.1
= control target key start
LH: loop header
LB: loop body
LE: loop exit
PB: predicated region body
PF: predicated region fallthrough
CT: control target
= control target key end

     0   :  { %s40_s0 = inlined_call_operand.vmem [shape: f32[1,2048], index: 0, kind: input, shape index: {}]   ;;  %s41_s1 = inlined_call_operand.vmem [shape: f32[1,2048], index: 1, kind: output, shape index: {}]  }
   0x1   :  { %v8_v0 = vld [vmem:[%s40_s0] sm:$0xff]  ;;  %v9_v1 = vld [vmem:[%s40_s0 + $0x8] sm:$0xff] }
   0x2   :  { %v10_v2 = vmul.f32 0.0, %v8_v0  ;;  %v11_v3 = vmul.f32 0.0, %v9_v1 }
   0x4   :  { %12 = vst [vmem:[%s41_s1] sm:$0xff] %v10_v2  ;;  %13 = vst [vmem:[%s41_s1 + $0x8] sm:$0xff] %v11_v3 }

</bundles_post_ra>
